<compile_context>
chip_gen: v5e
topology: v5e:2x2
jax: 0.10.0
libtpu: 0.0.40
codegen_flags: <defaults>
</compile_context>

<pallas_src>
import functools

import jax
import jax.numpy as jnp
import numpy as np
from jax.experimental import pallas as pl
from jax.experimental.pallas import tpu as pltpu


def _round_up(x, m):
    return (x + m - 1) // m * m


def _hist_kernel(labels_ref, counts_ref, *, kg_pad, ki_pad, onehot_dtype):
    """One grid step of the joint-histogram accumulation.

    labels_ref : (2, TL) int32 tile; row 0 = global labels, row 1 = infered labels,
                 padding entries are -1 (match no class).
    counts_ref : (kg_pad, ki_pad) f32 joint-count block, resident across the
                 reduction ("arbitrary") grid axis.
    """
    step = pl.program_id(1)

    @pl.when(step == 0)
    def _init():
        counts_ref[...] = jnp.zeros_like(counts_ref)

    labels = labels_ref[...]                   # (2, TL) int32, lane-dense
    g = labels[0:1, :]                         # (1, TL)
    f = labels[1:2, :]                         # (1, TL)
    tl = labels.shape[1]

    cls_g = jax.lax.broadcasted_iota(jnp.int32, (kg_pad, tl), 0)
    cls_i = jax.lax.broadcasted_iota(jnp.int32, (ki_pad, tl), 0)
    oh_g = (g == cls_g).astype(onehot_dtype)   # (kg_pad, TL) one-hot (exact 0/1)
    oh_f = (f == cls_i).astype(onehot_dtype)   # (ki_pad, TL) one-hot (exact 0/1)

    # MXU: contract the TL lane axis of both one-hots (A @ B^T) -> exact per-tile
    # joint counts, accumulated in f32.
    counts_ref[...] += jax.lax.dot_general(
        oh_g, oh_f, (((1,), (1,)), ((), ())),
        preferred_element_type=jnp.float32)


def _mi_finalize_kernel(parts_ref, out_ref, *, inv_len):
    """Combine per-core partial counts and compute the MI loss.

    parts_ref : (P, kg_pad, ki_pad) f32 partial joint counts.
    out_ref   : (1, 1) f32 scalar loss.
    """
    counts = jnp.sum(parts_ref[...], axis=0)            # (kg_pad, ki_pad) exact counts
    joint = counts * inv_len                             # joint_prob
    marg_g = jnp.sum(joint, axis=1, keepdims=True)       # (kg_pad, 1)  lane reduce
    marg_i = jnp.sum(joint, axis=0, keepdims=True)       # (1, ki_pad)  sublane reduce
    denom = marg_g * marg_i
    valid = joint > 0.0                                   # joint>0 implies marginals>0
    ratio = jnp.where(valid, joint / jnp.where(valid, denom, 1.0), 1.0)
    # Per-sample accumulation in the reference loop == count-weighted bin sum.
    out_ref[0, 0] = jnp.sum(counts * joint * jnp.log(ratio))


def mutual_loss_int(global_vector, infered_vector, num_classes_g, num_classes_i,
                    *, num_parallel=2, onehot_dtype=jnp.float32):
    """JAX/Pallas equivalent of the PyTorch mutual_loss_int forward.

    global_vector, infered_vector: int arrays of shape (L,), labels in [0, num_classes_*).
    num_classes_g / num_classes_i: static upper bounds (>= max label + 1).
    num_parallel: leading "parallel" grid extent (2 exploits both v7x TensorCores;
                  harmless on v5e/v6e).
    onehot_dtype: f32 (default, portable/exact) or bf16 (exact 0/1, preferred on v6e/v7x).
    Returns a float32 scalar (the mutual-information loss).
    """
    L = int(global_vector.shape[0])
    num_parallel = max(1, int(num_parallel))
    kg_pad = _round_up(max(int(num_classes_g), 1), 8)
    ki_pad = _round_up(max(int(num_classes_i), 1), 8)

    # L-tile length: lane aligned, capped so per-step intermediates (two (K, TL)
    # int32 class-iotas + compares + one-hots + double-buffered label tiles) stay
    # well inside the scoped-VMEM default on every generation.
    itemsize = jnp.dtype(onehot_dtype).itemsize
    bytes_per_lane = (kg_pad + ki_pad) * (4 + 1 + itemsize) + 24
    budget = 8 * 1024 * 1024
    tl_cap = max(128, (budget // bytes_per_lane) // 128 * 128)
    per_core = -(-L // num_parallel)
    tl = min(32768, tl_cap, _round_up(per_core, 128))
    tiles_per_core = max(1, -(-per_core // tl))
    l_pad = num_parallel * tiles_per_core * tl

    g = jnp.asarray(global_vector, jnp.int32)
    f = jnp.asarray(infered_vector, jnp.int32)
    if l_pad != L:
        pad = jnp.full((l_pad - L,), -1, jnp.int32)   # -1 matches no bin
        g = jnp.concatenate([g, pad])
        f = jnp.concatenate([f, pad])
    # Single stacked lane-dense label stream: (P, T, 2, TL).
    labels = jnp.stack([g.reshape(num_parallel, tiles_per_core, tl),
                        f.reshape(num_parallel, tiles_per_core, tl)], axis=2)

    hist_kernel = functools.partial(
        _hist_kernel, kg_pad=kg_pad, ki_pad=ki_pad, onehot_dtype=onehot_dtype)
    counts_parts = pl.pallas_call(
        hist_kernel,
        out_shape=jax.ShapeDtypeStruct((num_parallel, kg_pad, ki_pad), jnp.float32),
        grid_spec=pltpu.PrefetchScalarGridSpec(
            num_scalar_prefetch=0,
            grid=(num_parallel, tiles_per_core),
            in_specs=[
                pl.BlockSpec((None, None, 2, tl), lambda p, i: (p, i, 0, 0)),
            ],
            out_specs=pl.BlockSpec((None, kg_pad, ki_pad), lambda p, i: (p, 0, 0)),
        ),
        compiler_params=pltpu.CompilerParams(
            dimension_semantics=("parallel", "arbitrary"),   # L-halves || , L-tiles = reduction
            vmem_limit_bytes=32 * 1024 * 1024,
        ),
    )(labels)

    # Tiny finalize: combine partial counts, marginals via row/column sums, log term.
    fin_kernel = functools.partial(_mi_finalize_kernel, inv_len=np.float32(1.0 / L))
    out = pl.pallas_call(
        fin_kernel,
        out_shape=jax.ShapeDtypeStruct((1, 1), jnp.float32),
    )(counts_parts)
    return out[0, 0]


def _reference_numpy(global_vector, infered_vector):
    """Direct port of the PyTorch forward (numpy), for verification."""
    g = np.asarray(global_vector)
    f = np.asarray(infered_vector)
    joint = np.zeros((g.max() + 1, f.max() + 1), dtype=np.float64)
    for i in range(len(g)):
        joint[g[i], f[i]] += 1
    joint = joint / len(g)
    mg = joint.sum(axis=1)
    mi_ = joint.sum(axis=0)
    mutual = 0.0
    for i in range(len(g)):
        pg = mg[g[i]]
        pi = mi_[f[i]]
        pj = joint[g[i], f[i]]
        if pj > 0 and pg > 0 and pi > 0:
            mutual += pj * np.log(pj / (pg * pi))
    return np.float32(mutual)


if __name__ == "__main__":
    key = jax.random.PRNGKey(0)
    kg_key, ki_key = jax.random.split(key)

    L = 256          # number of samples
    K_G = 8          # static bound on global labels
    K_I = 8          # static bound on infered labels

    global_vec = jax.random.randint(kg_key, (L,), 0, 6, dtype=jnp.int32)
    infered_vec = jax.random.randint(ki_key, (L,), 0, 5, dtype=jnp.int32)

    mi = mutual_loss_int(global_vec, infered_vec, K_G, K_I)
    mi = jax.block_until_ready(mi)

    ref = _reference_numpy(np.asarray(global_vec), np.asarray(infered_vec))
    np.testing.assert_allclose(np.asarray(mi), ref, rtol=1e-4, atol=1e-5)

    print("KERNEL_OK")
</pallas_src>

<mosaic_0001>
module attributes {stable_mosaic.version = 11 : i64} {
  func.func @_hist_kernel(%arg0: i32, %arg1: i32, %arg2: memref<1x1x2x128xi32, #tpu.memory_space<vmem>>, %arg3: memref<1x8x8xf32, #tpu.memory_space<vmem>>) attributes {dimension_semantics = [#tpu.dimension_semantics<parallel>, #tpu.dimension_semantics<arbitrary>], iteration_bounds = array<i64: 2, 1>, scalar_prefetch = 0 : i64, scratch_operands = 0 : i64, tpu.core_type = #tpu.core_type<tc>, window_params = [{transform_indices = @transform_0, window_bounds = array<i64: 1, 1, 2, 128>}, {transform_indices = @transform_1, window_bounds = array<i64: 1, 8, 8>}]} {
    %c0_i32 = arith.constant 0 : i32
    %0 = arith.cmpi eq, %arg1, %c0_i32 : i32
    %1 = arith.extui %0 : i1 to i32
    %c0_i32_0 = arith.constant 0 : i32
    %2 = arith.cmpi ne, %1, %c0_i32_0 : i32
    scf.if %2 {
      %cst_10 = arith.constant 0.000000e+00 : f32
      %24 = vector.broadcast %cst_10 : f32 to vector<8x8xf32>
      %c0_11 = arith.constant 0 : index
      %c0_12 = arith.constant 0 : index
      %c0_13 = arith.constant 0 : index
      %25 = vector.load %arg3[%c0_11, %c0_12, %c0_13] : memref<1x8x8xf32, #tpu.memory_space<vmem>>, vector<1x8x8xf32>
      %26 = vector.shape_cast %25 : vector<1x8x8xf32> to vector<8x8xf32>
      %27 = vector.shape_cast %24 : vector<8x8xf32> to vector<1x8x8xf32>
      tpu.vector_store %arg3[%c0_11, %c0_12, %c0_13], %27 {strides = array<i32>} : memref<1x8x8xf32, #tpu.memory_space<vmem>>, vector<1x8x8xf32>,
    } else {
    }
    %c0 = arith.constant 0 : index
    %c0_1 = arith.constant 0 : index
    %c0_2 = arith.constant 0 : index
    %c0_3 = arith.constant 0 : index
    %3 = vector.load %arg2[%c0, %c0_1, %c0_2, %c0_3] : memref<1x1x2x128xi32, #tpu.memory_space<vmem>>, vector<1x1x2x128xi32>
    %4 = vector.shape_cast %3 : vector<1x1x2x128xi32> to vector<2x128xi32>
    %5 = vector.extract_strided_slice %4 {offsets = [0, 0], sizes = [1, 128], strides = [1, 1]} : vector<2x128xi32> to vector<1x128xi32>
    %6 = vector.extract_strided_slice %4 {offsets = [1, 0], sizes = [1, 128], strides = [1, 1]} : vector<2x128xi32> to vector<1x128xi32>
    %7 = tpu.iota {dimensions = array<i32: 0>} : vector<8x128xi32>
    %8 = tpu.iota {dimensions = array<i32: 0>} : vector<8x128xi32>
    %9 = vector.broadcast %5 : vector<1x128xi32> to vector<8x128xi32>
    %10 = arith.cmpi eq, %9, %7 : vector<8x128xi32>
    %11 = arith.extui %10 : vector<8x128xi1> to vector<8x128xi32>
    %12 = arith.sitofp %11 : vector<8x128xi32> to vector<8x128xf32>
    %13 = vector.broadcast %6 : vector<1x128xi32> to vector<8x128xi32>
    %14 = arith.cmpi eq, %13, %8 : vector<8x128xi32>
    %15 = arith.extui %14 : vector<8x128xi1> to vector<8x128xi32>
    %16 = arith.sitofp %15 : vector<8x128xi32> to vector<8x128xf32>
    %c0_4 = arith.constant 0 : index
    %c0_5 = arith.constant 0 : index
    %c0_6 = arith.constant 0 : index
    %17 = vector.load %arg3[%c0_4, %c0_5, %c0_6] : memref<1x8x8xf32, #tpu.memory_space<vmem>>, vector<1x8x8xf32>
    %18 = vector.shape_cast %17 : vector<1x8x8xf32> to vector<8x8xf32>
    %cst = arith.constant dense<0.000000e+00> : vector<8x8xf32>
    %19 = tpu.matmul %12, %16, %cst {dimension_numbers = #tpu.dot_dimension_numbers<[1], [1], [0], [0], [0, 0, 1, 0], [], []>} : vector<8x128xf32>, vector<8x128xf32>, vector<8x8xf32> -> vector<8x8xf32>
    %20 = arith.addf %18, %19 : vector<8x8xf32>
    %c0_7 = arith.constant 0 : index
    %c0_8 = arith.constant 0 : index
    %c0_9 = arith.constant 0 : index
    %21 = vector.load %arg3[%c0_7, %c0_8, %c0_9] : memref<1x8x8xf32, #tpu.memory_space<vmem>>, vector<1x8x8xf32>
    %22 = vector.shape_cast %21 : vector<1x8x8xf32> to vector<8x8xf32>
    %23 = vector.shape_cast %20 : vector<8x8xf32> to vector<1x8x8xf32>
    tpu.vector_store %arg3[%c0_7, %c0_8, %c0_9], %23 {strides = array<i32>} : memref<1x8x8xf32, #tpu.memory_space<vmem>>, vector<1x8x8xf32>,
    return
  }
  func.func @transform_0(%arg0: i32, %arg1: i32) -> (i32, i32, i32, i32) {
    %c0_i32 = arith.constant 0 : i32
    %c0_i32_0 = arith.constant 0 : i32
    %c0_i32_1 = arith.constant 0 : i32
    return %arg0, %arg1, %c0_i32, %c0_i32_0 : i32, i32, i32, i32
  }
  func.func @transform_1(%arg0: i32, %arg1: i32) -> (i32, i32, i32) {
    %c0_i32 = arith.constant 0 : i32
    %c0_i32_0 = arith.constant 0 : i32
    %c0_i32_1 = arith.constant 0 : i32
    return %arg0, %c0_i32, %c0_i32_0 : i32, i32, i32
  }
}

</mosaic_0001>

<bundles_post_ra>
// kernel: tpu_custom_call.1
= control target key start
LH: loop header
LB: loop body
LE: loop exit
PB: predicated region body
PF: predicated region fallthrough
CT: control target
= control target key end

     0   :  { %6 = vsyncpa [#allocation3], 0  ;;  %s615_s0 = inlined_call_operand.hbm [shape: s32[2,1,2,128], index: 0, kind: input, shape index: {}]   ;;  %s616_s1 = inlined_call_operand.hbm [shape: f32[2,8,8], index: 1, kind: output, shape index: {}]  }
   0x1   :  { %8 = vsyncpa [#allocation3 + $0x1], 0 }
   0x2   :  { %9 = vsyncpa [#allocation4], 0 }
   0x3   :  { %11 = vsyncpa [#allocation4 + $0x1], 0  ;;  %s492_s6 = smov 0   ;;  %s494_s7 = smov 0  }
   0x4   :  { %s496_s8 = smov 0   ;;  %s498_s9 = smov 0  }
   0x5   :  { %s500_s10 = smov 0   ;;  %s502_s11 = smov 0  }
   0x6 LB: > { %s285_s12 = sadd.s32 4294967295, %s478_s11   ;;  %s286_s13 = sadd.s32 4294967294, %s478_s11   ;;  %s478_s11 = sphi %s502_s11, %s17_s11   ;;  %s474_s10 = sphi %s500_s10, %s625_s10   ;;  %s470_s9 = sphi %s498_s9, %s624_s9   ;;  %s466_s8 = sphi %s496_s8, %s623_s8   ;;  %s462_s7 = sphi %s494_s7, %s622_s7   ;;  %s458_s6 = sphi %s492_s6, %s621_s6  }
   0x7   : > { %s29_s14 = sadd.s32 1, %s474_s10  ;;  %s38_s15 = sadd.s32 1, %s466_s8 }
   0x8   : > { %p31_p0 = scmp.ge.s32.totalorder %s29_s14, 2  ;;  %p45_p1 = scmp.ne.s32.totalorder %s466_s8, %s462_s7 }
   0x9   : > { %p46_p2 = scmp.eq.s32.totalorder %s478_s11, 0  ;;  %p51_p3 = scmp.ne.s32.totalorder %s462_s7, %s458_s6 }
   0xa   : > { %s627_s14 = smov (%p31_p0, %s29_s14), 0  ;;  %p52_p5 = scmp.eq.s32.totalorder %s285_s12, 0 }
   0xb   : > { %p533_p4 = por %p46_p2, %p45_p1  ;;  %s33_s17 = ssub.s32 %s474_s10, %s627_s14 }
   0xc   : > { %p75_p6 = scmp.eq.s32.totalorder %s285_s12, 1  ;;  %p36_p7 = scmp.eq.s32.totalorder %s33_s17, 0 }
   0xd   : > { %p539_p8 = por %p52_p5, %p51_p3  ;;  %p81_p10 = scmp.eq.s32.totalorder %s286_s13, 1 }
   0xe   : > { %p543_p9 = por %p75_p6, %p45_p1  ;;  %p288_p12 = scmp.ge.s32.totalorder %s478_s11, 2 }
   0xf   : > { %s548_s20 = scalar_select %p36_p7, %s466_s8, %s38_s15  }
  0x10   : > { %p550_p11 = por %p81_p10, %p51_p3  ;;  %p314_p13 = scmp.lt.s32.totalorder %s478_s11, 2 }
  0x11   : > { %s101_s22 = sand.u32 1, %s466_s8   ;;  %s290_s24 = sshll.u32 %s474_s10, 1 }
  0x12   : > { %s289_s23 = sshll.u32 %s101_s22, 1  ;;  %s110_s27 = scalar_lea.hbm %s615_s0, %s290_s24 }
  0x13   : > { %s105_s28 = scalar_lea.vmem [#allocation2], %s289_s23  ;;  %s112_s30 = sshll.u32 %s110_s27, 4  ;;  %s113_s30 = int_to_ptr.hbm [resolvable:$true] %s112_s30 }
  0x14   : > { %s114_s29 = sshll.u32 %s105_s28, 4  ;;  %p307_p0 = pnand %p314_p13, %p533_p4  ;;  %s115_s29 = int_to_ptr.vmem [resolvable:$true] %s114_s29 }
  0x15   : > { %p291_p1 = scmp.ge.s32.totalorder %s478_s11, 1  ;;  %p119_p2 = scmp.lt.s32.totalorder %s478_s11, 3 }
  0x16   : > { %s102_s2 = scalar_lea.sflag [#allocation3], %s101_s22 }
  0x17   : > { %309 = dma.hbm_to_vmem [thread:$0]  (!%p307_p0), %s113_s30, 32, %s115_s29, %s102_s2  }
  0x18   : > { %p120_p3 = pnand %p291_p1, %p119_p2 }
  0x19   : > { %s566_s3 = sand.u32 (!%p120_p3), 1, %s462_s7  }
  0x1a   : > { %123 = sbr.rel (%p120_p3) target bundleno = 171 (0xab), region = 24  ;;  %s292_s4 = sshll.u32 (!%p120_p3), %s566_s3, 1 }
  0x1b   : > { %s126_s5 = scalar_lea.sflag (!%p120_p3), [#allocation3], %s566_s3  ;;  %s129_s12 = scalar_lea.vmem (!%p120_p3), [#allocation2], %s292_s4 }
  0x1f   : > { %449 = dma.done.wait (%p539_p8), %s126_s5, 32  }
  0x20   : > { %451 = vsyncadd (%p539_p8), %s126_s5, 4294967264  ;;  %s293_s13 = sshll.u32 %s566_s3, 3  ;;  %vm153_vm0 = vcmask 64512   ;;  %v156_v0 = vlaneseq  ;;  %v480_v1 = vmov 0.0   ;;  %v155_v3 = vld [vmem:[%s129_s12] sm:$0x3] }
  0x21   : > { %s148_s15 = scalar_lea.vmem [#allocation5], %s293_s13  ;;  %v162_v4 = vperm.slane %v155_v3, 1  ;;  %v158_v5 = vperm.slane %v155_v3, 0  ;;  %v481_v6 = vmov 1.0   ;;  %s299_s16 = sshll.u32 %s470_s9, 3 }
  0x22   : > { %154 = vst.msk [vmem:[%s148_s15] sm:$0xff] %vm153_vm0, %v480_v1  ;;  %v157_v2 = vshrl.u32 %v156_v0, 7  ;;  %s201_s22 = scalar_lea.hbm %s616_s1, %s299_s16  ;;  %s203_s23 = sshll.u32 %s148_s15, 4  ;;  %s204_s23 = int_to_ptr.vmem [resolvable:$true] %s203_s23 }
  0x23   : > { %s205_s24 = sshll.u32 %s201_s22, 4  ;;  %s191_s25 = scalar_lea.sflag [#allocation4], %s566_s3  ;;  %s206_s24 = int_to_ptr.hbm [resolvable:$true] %s205_s24 }
  0x24   : > { %vm163_vm1 = vcmp.eq.s32.totalorder %v162_v4, %v157_v2  ;;  %vm159_vm2 = vcmp.eq.s32.totalorder %v158_v5, %v157_v2  ;;  %s410_s26 = sshra.s32 %s206_s24, 4  ;;  %s416_s29 = scalar_lea.hbm %s616_s1, 16  ;;  %s411_s26 = int_to_ptr.hbm [resolvable:$true] %s410_s26 }
  0x25   : > { %296 = vmatpush.xpose.msk.msra.mxu0 %vm163_vm1, %v481_v6  ;;  %s412_s27 = scalar_lea.hbm %s411_s26, 8  ;;  %p417_p7 = scmp.lt.s32.totalorder %s411_s26, %s616_s1 }
  0x26   : > { %p413_p4 = scmp.ne.s32.totalorder %s411_s26, %s412_s27  ;;  %p418_p8 = scmp.lt.s32.totalorder %s416_s29, %s412_s27 }
  0x28   : > { %297 = vmatmul.msk.f32.vlgmr.msra.gmra.mxu0 %vm159_vm2, %v481_v6  ;;  %p414_p5 = pnand %p413_p4, %p543_p9  ;;  %p419_p10 = por %p418_p8, %p417_p7 }
  0x29   : > { %v166_v7 = vld [vmem:[%s148_s15] sm:$0xff] }
  0x2a   : > { %p415_p6 = pneg %p414_p5 }
  0x2c   : > { %p420_p13 = pnand %p419_p10, %p415_p6 }
  0xa5   : > { %v184_v8 = vpop.f32.mrf.mxu0 }
  0xa6   : > { %v187_v9 = vadd.f32 %v184_v8, %v166_v7 }
  0xa8   : > { %189 = vst.msk [vmem:[%s148_s15] sm:$0xff] %vm153_vm0, %v187_v9 }
  0xa9   : > { %423 = shalt.err (!%p420_p13)
}
  0xaa   : > { %304 = dma.vmem_to_hbm [thread:$0]  (%p543_p9), %s204_s23, 128, %s206_s24, %s191_s25  }
  0xab PF: > { %s217_s3 = sand.u32 1, %s458_s6   ;;  %p311_p0 = pnand %p288_p12, %p550_p11 }
  0xac   : > { %s218_s4 = scalar_lea.sflag [#allocation4], %s217_s3 }
  0xad   : > { %p312_p1 = pneg %p311_p0 }
  0xaf   : > { %453 = dma.done.wait (%p312_p1), %s218_s4, 128  }
  0xb0   : > { %455 = vsyncadd (%p312_p1), %s218_s4, 4294967168  ;;  %s17_s11 = sadd.s32 1, %s478_s11   ;;  %s621_s6 = smov %s462_s7 }
  0xb1   : > { %p14_p2 = scmp.ge.s32.totalorder %s17_s11, 4   ;;  %s622_s7 = smov %s466_s8 }
  0xb2   : > { %s623_s8 = smov %s548_s20  ;;  %s624_s9 = smov %s474_s10 }
  0xb3   : > { %s625_s10 = smov %s627_s14  ;;  %16 = sbr.rel (!%p14_p2) target bundleno = 6 (0x6), region = 73 }
  0xb8   :  { %224 = vsyncpa [#allocation3], 1 }
  0xb9   :  { %226 = vsyncpa [#allocation3 + $0x1], 1 }
  0xba   :  { %227 = vsyncpa [#allocation4], 1 }
  0xbb   :  { %229 = vsyncpa [#allocation4 + $0x1], 1 }

</bundles_post_ra>
